<compile_context>
chip_gen: v6e
topology: v6e:2x2x1
jax: 0.10.0
libtpu: 0.0.40
codegen_flags: <defaults>
</compile_context>

<pallas_src>
import jax
import jax.numpy as jnp
from jax import lax
from jax.experimental import pallas as pl
from jax.experimental.pallas import tpu as pltpu


def _shift_kernel(shift_ref, x_ref, o_ref):
    # shift_ref: SMEM scalar-prefetch ref, shape (B_pad,), int32
    # x_ref / o_ref: one block of BB samples, [BB, C, T_pad] in VMEM
    bb, C, Tp = x_ref.shape
    base = pl.program_id(0) * bb

    # Hoisted once per block: time index along lanes.
    t_idx = lax.broadcasted_iota(jnp.int32, (C, Tp), dimension=1)

    # Small static unroll over the samples in this block.
    for i in range(bb):
        s = shift_ref[base + i]
        # XLU roll along time: rolled[t] = x[(t - s) mod Tp]; floor-mod
        # normalizes negative shifts into [0, Tp).
        rolled = pltpu.roll(x_ref[i], s % Tp, axis=1)
        # Zero the wrapped-around region so the result matches zero padding.
        # Valid positions: 0 <= t - s < Tp, as one unsigned compare.
        valid = (t_idx - s).astype(jnp.uint32) < jnp.uint32(Tp)
        o_ref[i] = jnp.where(valid, rolled, 0.0)


def data_aug_shift_batched(waveforms: jax.Array, shifts: jax.Array) -> jax.Array:
    """Apply per-sample DataAug time shifts.

    waveforms: [B, C, T] float array.
    shifts:    [B] int32 array (one shift per sample).
    """
    B, C, T = waveforms.shape
    shifts = shifts.astype(jnp.int32)
    itemsize = jnp.dtype(waveforms.dtype).itemsize

    # Lane-dense stores: pad T up to a multiple of 128 with zeros.
    T_pad = ((T + 127) // 128) * 128

    # Samples per grid step: amortize per-step overhead, bounded by a modest
    # per-buffer VMEM budget (double-buffered input + output).
    vmem_budget = 2 << 20  # 2 MiB per block buffer
    bb_cap = max(1, vmem_budget // (C * T_pad * itemsize))
    BB = max(1, min(B, 8, bb_cap))
    B_pad = ((B + BB - 1) // BB) * BB

    if T_pad != T or B_pad != B:
        waveforms = jnp.pad(
            waveforms, ((0, B_pad - B), (0, 0), (0, T_pad - T))
        )
    if B_pad != B:
        shifts = jnp.pad(shifts, (0, B_pad - B))

    out = pl.pallas_call(
        _shift_kernel,
        out_shape=jax.ShapeDtypeStruct((B_pad, C, T_pad), waveforms.dtype),
        grid_spec=pltpu.PrefetchScalarGridSpec(
            num_scalar_prefetch=1,
            grid=(B_pad // BB,),
            in_specs=[pl.BlockSpec((BB, C, T_pad), lambda g, s: (g, 0, 0))],
            out_specs=pl.BlockSpec((BB, C, T_pad), lambda g, s: (g, 0, 0)),
        ),
        compiler_params=pltpu.CompilerParams(
            dimension_semantics=("parallel",),
        ),
        cost_estimate=pl.CostEstimate(
            flops=0,
            transcendentals=0,
            bytes_accessed=2 * B_pad * C * T_pad * itemsize,
        ),
    )(shifts, waveforms)

    if T_pad != T or B_pad != B:
        out = out[:B, :, :T]
    return out


def data_aug_shift(waveform: jax.Array, shift: jax.Array) -> jax.Array:
    """Single-sample convenience wrapper: waveform [C, T], shift scalar int."""
    out = data_aug_shift_batched(waveform[None], jnp.reshape(shift, (1,)))
    return out[0]


def _reference_shift(waveform, shift):
    # Pure-JAX reference mirroring the PyTorch F.pad logic (shift concrete).
    s = int(shift)
    if s > 0:
        return jnp.pad(waveform[:, :-s], ((0, 0), (s, 0)))
    elif s < 0:
        return jnp.pad(waveform[:, -s:], ((0, 0), (0, -s)))
    return waveform


if __name__ == "__main__":
    # Small deterministic example: 6 samples, 2 channels, 1000 time steps
    # ("sample_rate"=1000 so max shift = int(0.1 * 1000) = 100, same
    # construction as the PyTorch module). T=1000 exercises the lane padding
    # path and B=6 exercises the batch padding path. The host-side
    # random.randint draw from the module is replaced by jax.random here.
    sample_rate = 1000
    shift_factor = int(0.1 * sample_rate)

    key = jax.random.PRNGKey(0)
    k_wav, k_shift = jax.random.split(key)

    B, C, T = 6, 2, sample_rate
    waveforms = jax.random.normal(k_wav, (B, C, T), dtype=jnp.float32)
    # random.randint(-shift_factor, shift_factor) is inclusive on both ends.
    shifts = jax.random.randint(
        k_shift, (B,), -shift_factor, shift_factor + 1, dtype=jnp.int32
    )

    out = data_aug_shift_batched(waveforms, shifts)
    out = jax.block_until_ready(out)

    assert out.shape == waveforms.shape and out.dtype == waveforms.dtype
    for b in range(B):
        ref = _reference_shift(waveforms[b], int(shifts[b]))
        assert jnp.allclose(out[b], ref), f"mismatch vs reference at sample {b}"

    print("KERNEL_OK")
</pallas_src>

<mosaic_0001>
module attributes {stable_mosaic.version = 11 : i64} {
  func.func @_shift_kernel(%arg0: i32, %arg1: memref<6xi32, #tpu.memory_space<smem>>, %arg2: memref<6x2x1024xf32, #tpu.memory_space<vmem>>, %arg3: memref<6x2x1024xf32, #tpu.memory_space<vmem>>) attributes {dimension_semantics = [#tpu.dimension_semantics<parallel>], iteration_bounds = array<i64: 1>, scalar_prefetch = 1 : i64, scratch_operands = 0 : i64, tpu.core_type = #tpu.core_type<tc>, window_params = [{transform_indices = @transform_0, window_bounds = array<i64: 6, 2, 1024>}, {transform_indices = @transform_1, window_bounds = array<i64: 6, 2, 1024>}]} {
    %c6_i32 = arith.constant 6 : i32
    %0 = arith.muli %arg0, %c6_i32 : i32
    %1 = tpu.iota {dimensions = array<i32: 1>} : vector<2x1024xi32>
    %c0_i32 = arith.constant 0 : i32
    %2 = arith.addi %0, %c0_i32 : i32
    %3 = arith.index_cast %2 : i32 to index
    %4 = memref.load %arg1[%3] : memref<6xi32, #tpu.memory_space<smem>>
    %c0 = arith.constant 0 : index
    %c0_0 = arith.constant 0 : index
    %c0_1 = arith.constant 0 : index
    %5 = vector.load %arg2[%c0, %c0_0, %c0_1] : memref<6x2x1024xf32, #tpu.memory_space<vmem>>, vector<1x2x1024xf32>
    %6 = vector.shape_cast %5 : vector<1x2x1024xf32> to vector<2x1024xf32>
    %c1024_i32 = arith.constant 1024 : i32
    %c0_i32_2 = arith.constant 0 : i32
    %7 = arith.cmpi eq, %c1024_i32, %c0_i32_2 : i32
    %c1_i32 = arith.constant 1 : i32
    %8 = arith.select %7, %c1_i32, %c1024_i32 : i32
    %9 = arith.remsi %4, %8 : i32
    %c0_i32_3 = arith.constant 0 : i32
    %10 = arith.cmpi ne, %9, %c0_i32_3 : i32
    %c0_i32_4 = arith.constant 0 : i32
    %11 = arith.cmpi slt, %9, %c0_i32_4 : i32
    %c0_i32_5 = arith.constant 0 : i32
    %12 = arith.cmpi slt, %8, %c0_i32_5 : i32
    %13 = arith.xori %11, %12 : i1
    %14 = arith.andi %13, %10 : i1
    %15 = arith.addi %9, %8 : i32
    %16 = arith.select %14, %15, %9 : i32
    %17 = tpu.dynamic_rotate %6 by %16 dim 1 : vector<2x1024xf32>, i32 -> vector<2x1024xf32>
    %18 = vector.broadcast %4 : i32 to vector<2x1024xi32>
    %19 = arith.subi %1, %18 : vector<2x1024xi32>
    %c1024_i32_6 = arith.constant 1024 : i32
    %20 = vector.broadcast %c1024_i32_6 : i32 to vector<2x1024xi32>
    %21 = arith.cmpi ult, %19, %20 : vector<2x1024xi32>
    %cst = arith.constant 0.000000e+00 : f32
    %22 = vector.broadcast %cst : f32 to vector<2x1024xf32>
    %23 = arith.select %21, %17, %22 : vector<2x1024xi1>, vector<2x1024xf32>
    %c0_7 = arith.constant 0 : index
    %c0_8 = arith.constant 0 : index
    %c0_9 = arith.constant 0 : index
    %24 = vector.load %arg3[%c0_7, %c0_8, %c0_9] : memref<6x2x1024xf32, #tpu.memory_space<vmem>>, vector<1x2x1024xf32>
    %25 = vector.shape_cast %24 : vector<1x2x1024xf32> to vector<2x1024xf32>
    %26 = vector.shape_cast %23 : vector<2x1024xf32> to vector<1x2x1024xf32>
    tpu.vector_store %arg3[%c0_7, %c0_8, %c0_9], %26 {strides = array<i32>} : memref<6x2x1024xf32, #tpu.memory_space<vmem>>, vector<1x2x1024xf32>,
    %c1_i32_10 = arith.constant 1 : i32
    %27 = arith.addi %0, %c1_i32_10 : i32
    %28 = arith.index_cast %27 : i32 to index
    %29 = memref.load %arg1[%28] : memref<6xi32, #tpu.memory_space<smem>>
    %c1 = arith.constant 1 : index
    %c0_11 = arith.constant 0 : index
    %c0_12 = arith.constant 0 : index
    %30 = vector.load %arg2[%c1, %c0_11, %c0_12] : memref<6x2x1024xf32, #tpu.memory_space<vmem>>, vector<1x2x1024xf32>
    %31 = vector.shape_cast %30 : vector<1x2x1024xf32> to vector<2x1024xf32>
    %c1024_i32_13 = arith.constant 1024 : i32
    %c0_i32_14 = arith.constant 0 : i32
    %32 = arith.cmpi eq, %c1024_i32_13, %c0_i32_14 : i32
    %c1_i32_15 = arith.constant 1 : i32
    %33 = arith.select %32, %c1_i32_15, %c1024_i32_13 : i32
    %34 = arith.remsi %29, %33 : i32
    %c0_i32_16 = arith.constant 0 : i32
    %35 = arith.cmpi ne, %34, %c0_i32_16 : i32
    %c0_i32_17 = arith.constant 0 : i32
    %36 = arith.cmpi slt, %34, %c0_i32_17 : i32
    %c0_i32_18 = arith.constant 0 : i32
    %37 = arith.cmpi slt, %33, %c0_i32_18 : i32
    %38 = arith.xori %36, %37 : i1
    %39 = arith.andi %38, %35 : i1
    %40 = arith.addi %34, %33 : i32
    %41 = arith.select %39, %40, %34 : i32
    %42 = tpu.dynamic_rotate %31 by %41 dim 1 : vector<2x1024xf32>, i32 -> vector<2x1024xf32>
    %43 = vector.broadcast %29 : i32 to vector<2x1024xi32>
    %44 = arith.subi %1, %43 : vector<2x1024xi32>
    %c1024_i32_19 = arith.constant 1024 : i32
    %45 = vector.broadcast %c1024_i32_19 : i32 to vector<2x1024xi32>
    %46 = arith.cmpi ult, %44, %45 : vector<2x1024xi32>
    %cst_20 = arith.constant 0.000000e+00 : f32
    %47 = vector.broadcast %cst_20 : f32 to vector<2x1024xf32>
    %48 = arith.select %46, %42, %47 : vector<2x1024xi1>, vector<2x1024xf32>
    %c1_21 = arith.constant 1 : index
    %c0_22 = arith.constant 0 : index
    %c0_23 = arith.constant 0 : index
    %49 = vector.load %arg3[%c1_21, %c0_22, %c0_23] : memref<6x2x1024xf32, #tpu.memory_space<vmem>>, vector<1x2x1024xf32>
    %50 = vector.shape_cast %49 : vector<1x2x1024xf32> to vector<2x1024xf32>
    %51 = vector.shape_cast %48 : vector<2x1024xf32> to vector<1x2x1024xf32>
    tpu.vector_store %arg3[%c1_21, %c0_22, %c0_23], %51 {strides = array<i32>} : memref<6x2x1024xf32, #tpu.memory_space<vmem>>, vector<1x2x1024xf32>,
    %c2_i32 = arith.constant 2 : i32
    %52 = arith.addi %0, %c2_i32 : i32
    %53 = arith.index_cast %52 : i32 to index
    %54 = memref.load %arg1[%53] : memref<6xi32, #tpu.memory_space<smem>>
    %c2 = arith.constant 2 : index
    %c0_24 = arith.constant 0 : index
    %c0_25 = arith.constant 0 : index
    %55 = vector.load %arg2[%c2, %c0_24, %c0_25] : memref<6x2x1024xf32, #tpu.memory_space<vmem>>, vector<1x2x1024xf32>
    %56 = vector.shape_cast %55 : vector<1x2x1024xf32> to vector<2x1024xf32>
    %c1024_i32_26 = arith.constant 1024 : i32
    %c0_i32_27 = arith.constant 0 : i32
    %57 = arith.cmpi eq, %c1024_i32_26, %c0_i32_27 : i32
    %c1_i32_28 = arith.constant 1 : i32
    %58 = arith.select %57, %c1_i32_28, %c1024_i32_26 : i32
    %59 = arith.remsi %54, %58 : i32
    %c0_i32_29 = arith.constant 0 : i32
    %60 = arith.cmpi ne, %59, %c0_i32_29 : i32
    %c0_i32_30 = arith.constant 0 : i32
    %61 = arith.cmpi slt, %59, %c0_i32_30 : i32
    %c0_i32_31 = arith.constant 0 : i32
    %62 = arith.cmpi slt, %58, %c0_i32_31 : i32
    %63 = arith.xori %61, %62 : i1
    %64 = arith.andi %63, %60 : i1
    %65 = arith.addi %59, %58 : i32
    %66 = arith.select %64, %65, %59 : i32
    %67 = tpu.dynamic_rotate %56 by %66 dim 1 : vector<2x1024xf32>, i32 -> vector<2x1024xf32>
    %68 = vector.broadcast %54 : i32 to vector<2x1024xi32>
    %69 = arith.subi %1, %68 : vector<2x1024xi32>
    %c1024_i32_32 = arith.constant 1024 : i32
    %70 = vector.broadcast %c1024_i32_32 : i32 to vector<2x1024xi32>
    %71 = arith.cmpi ult, %69, %70 : vector<2x1024xi32>
    %cst_33 = arith.constant 0.000000e+00 : f32
    %72 = vector.broadcast %cst_33 : f32 to vector<2x1024xf32>
    %73 = arith.select %71, %67, %72 : vector<2x1024xi1>, vector<2x1024xf32>
    %c2_34 = arith.constant 2 : index
    %c0_35 = arith.constant 0 : index
    %c0_36 = arith.constant 0 : index
    %74 = vector.load %arg3[%c2_34, %c0_35, %c0_36] : memref<6x2x1024xf32, #tpu.memory_space<vmem>>, vector<1x2x1024xf32>
    %75 = vector.shape_cast %74 : vector<1x2x1024xf32> to vector<2x1024xf32>
    %76 = vector.shape_cast %73 : vector<2x1024xf32> to vector<1x2x1024xf32>
    tpu.vector_store %arg3[%c2_34, %c0_35, %c0_36], %76 {strides = array<i32>} : memref<6x2x1024xf32, #tpu.memory_space<vmem>>, vector<1x2x1024xf32>,
    %c3_i32 = arith.constant 3 : i32
    %77 = arith.addi %0, %c3_i32 : i32
    %78 = arith.index_cast %77 : i32 to index
    %79 = memref.load %arg1[%78] : memref<6xi32, #tpu.memory_space<smem>>
    %c3 = arith.constant 3 : index
    %c0_37 = arith.constant 0 : index
    %c0_38 = arith.constant 0 : index
    %80 = vector.load %arg2[%c3, %c0_37, %c0_38] : memref<6x2x1024xf32, #tpu.memory_space<vmem>>, vector<1x2x1024xf32>
    %81 = vector.shape_cast %80 : vector<1x2x1024xf32> to vector<2x1024xf32>
    %c1024_i32_39 = arith.constant 1024 : i32
    %c0_i32_40 = arith.constant 0 : i32
    %82 = arith.cmpi eq, %c1024_i32_39, %c0_i32_40 : i32
    %c1_i32_41 = arith.constant 1 : i32
    %83 = arith.select %82, %c1_i32_41, %c1024_i32_39 : i32
    %84 = arith.remsi %79, %83 : i32
    %c0_i32_42 = arith.constant 0 : i32
    %85 = arith.cmpi ne, %84, %c0_i32_42 : i32
    %c0_i32_43 = arith.constant 0 : i32
    %86 = arith.cmpi slt, %84, %c0_i32_43 : i32
    %c0_i32_44 = arith.constant 0 : i32
    %87 = arith.cmpi slt, %83, %c0_i32_44 : i32
    %88 = arith.xori %86, %87 : i1
    %89 = arith.andi %88, %85 : i1
    %90 = arith.addi %84, %83 : i32
    %91 = arith.select %89, %90, %84 : i32
    %92 = tpu.dynamic_rotate %81 by %91 dim 1 : vector<2x1024xf32>, i32 -> vector<2x1024xf32>
    %93 = vector.broadcast %79 : i32 to vector<2x1024xi32>
    %94 = arith.subi %1, %93 : vector<2x1024xi32>
    %c1024_i32_45 = arith.constant 1024 : i32
    %95 = vector.broadcast %c1024_i32_45 : i32 to vector<2x1024xi32>
    %96 = arith.cmpi ult, %94, %95 : vector<2x1024xi32>
    %cst_46 = arith.constant 0.000000e+00 : f32
    %97 = vector.broadcast %cst_46 : f32 to vector<2x1024xf32>
    %98 = arith.select %96, %92, %97 : vector<2x1024xi1>, vector<2x1024xf32>
    %c3_47 = arith.constant 3 : index
    %c0_48 = arith.constant 0 : index
    %c0_49 = arith.constant 0 : index
    %99 = vector.load %arg3[%c3_47, %c0_48, %c0_49] : memref<6x2x1024xf32, #tpu.memory_space<vmem>>, vector<1x2x1024xf32>
    %100 = vector.shape_cast %99 : vector<1x2x1024xf32> to vector<2x1024xf32>
    %101 = vector.shape_cast %98 : vector<2x1024xf32> to vector<1x2x1024xf32>
    tpu.vector_store %arg3[%c3_47, %c0_48, %c0_49], %101 {strides = array<i32>} : memref<6x2x1024xf32, #tpu.memory_space<vmem>>, vector<1x2x1024xf32>,
    %c4_i32 = arith.constant 4 : i32
    %102 = arith.addi %0, %c4_i32 : i32
    %103 = arith.index_cast %102 : i32 to index
    %104 = memref.load %arg1[%103] : memref<6xi32, #tpu.memory_space<smem>>
    %c4 = arith.constant 4 : index
    %c0_50 = arith.constant 0 : index
    %c0_51 = arith.constant 0 : index
    %105 = vector.load %arg2[%c4, %c0_50, %c0_51] : memref<6x2x1024xf32, #tpu.memory_space<vmem>>, vector<1x2x1024xf32>
    %106 = vector.shape_cast %105 : vector<1x2x1024xf32> to vector<2x1024xf32>
    %c1024_i32_52 = arith.constant 1024 : i32
    %c0_i32_53 = arith.constant 0 : i32
    %107 = arith.cmpi eq, %c1024_i32_52, %c0_i32_53 : i32
    %c1_i32_54 = arith.constant 1 : i32
    %108 = arith.select %107, %c1_i32_54, %c1024_i32_52 : i32
    %109 = arith.remsi %104, %108 : i32
    %c0_i32_55 = arith.constant 0 : i32
    %110 = arith.cmpi ne, %109, %c0_i32_55 : i32
    %c0_i32_56 = arith.constant 0 : i32
    %111 = arith.cmpi slt, %109, %c0_i32_56 : i32
    %c0_i32_57 = arith.constant 0 : i32
    %112 = arith.cmpi slt, %108, %c0_i32_57 : i32
    %113 = arith.xori %111, %112 : i1
    %114 = arith.andi %113, %110 : i1
    %115 = arith.addi %109, %108 : i32
    %116 = arith.select %114, %115, %109 : i32
    %117 = tpu.dynamic_rotate %106 by %116 dim 1 : vector<2x1024xf32>, i32 -> vector<2x1024xf32>
    %118 = vector.broadcast %104 : i32 to vector<2x1024xi32>
    %119 = arith.subi %1, %118 : vector<2x1024xi32>
    %c1024_i32_58 = arith.constant 1024 : i32
    %120 = vector.broadcast %c1024_i32_58 : i32 to vector<2x1024xi32>
    %121 = arith.cmpi ult, %119, %120 : vector<2x1024xi32>
    %cst_59 = arith.constant 0.000000e+00 : f32
    %122 = vector.broadcast %cst_59 : f32 to vector<2x1024xf32>
    %123 = arith.select %121, %117, %122 : vector<2x1024xi1>, vector<2x1024xf32>
    %c4_60 = arith.constant 4 : index
    %c0_61 = arith.constant 0 : index
    %c0_62 = arith.constant 0 : index
    %124 = vector.load %arg3[%c4_60, %c0_61, %c0_62] : memref<6x2x1024xf32, #tpu.memory_space<vmem>>, vector<1x2x1024xf32>
    %125 = vector.shape_cast %124 : vector<1x2x1024xf32> to vector<2x1024xf32>
    %126 = vector.shape_cast %123 : vector<2x1024xf32> to vector<1x2x1024xf32>
    tpu.vector_store %arg3[%c4_60, %c0_61, %c0_62], %126 {strides = array<i32>} : memref<6x2x1024xf32, #tpu.memory_space<vmem>>, vector<1x2x1024xf32>,
    %c5_i32 = arith.constant 5 : i32
    %127 = arith.addi %0, %c5_i32 : i32
    %128 = arith.index_cast %127 : i32 to index
    %129 = memref.load %arg1[%128] : memref<6xi32, #tpu.memory_space<smem>>
    %c5 = arith.constant 5 : index
    %c0_63 = arith.constant 0 : index
    %c0_64 = arith.constant 0 : index
    %130 = vector.load %arg2[%c5, %c0_63, %c0_64] : memref<6x2x1024xf32, #tpu.memory_space<vmem>>, vector<1x2x1024xf32>
    %131 = vector.shape_cast %130 : vector<1x2x1024xf32> to vector<2x1024xf32>
    %c1024_i32_65 = arith.constant 1024 : i32
    %c0_i32_66 = arith.constant 0 : i32
    %132 = arith.cmpi eq, %c1024_i32_65, %c0_i32_66 : i32
    %c1_i32_67 = arith.constant 1 : i32
    %133 = arith.select %132, %c1_i32_67, %c1024_i32_65 : i32
    %134 = arith.remsi %129, %133 : i32
    %c0_i32_68 = arith.constant 0 : i32
    %135 = arith.cmpi ne, %134, %c0_i32_68 : i32
    %c0_i32_69 = arith.constant 0 : i32
    %136 = arith.cmpi slt, %134, %c0_i32_69 : i32
    %c0_i32_70 = arith.constant 0 : i32
    %137 = arith.cmpi slt, %133, %c0_i32_70 : i32
    %138 = arith.xori %136, %137 : i1
    %139 = arith.andi %138, %135 : i1
    %140 = arith.addi %134, %133 : i32
    %141 = arith.select %139, %140, %134 : i32
    %142 = tpu.dynamic_rotate %131 by %141 dim 1 : vector<2x1024xf32>, i32 -> vector<2x1024xf32>
    %143 = vector.broadcast %129 : i32 to vector<2x1024xi32>
    %144 = arith.subi %1, %143 : vector<2x1024xi32>
    %c1024_i32_71 = arith.constant 1024 : i32
    %145 = vector.broadcast %c1024_i32_71 : i32 to vector<2x1024xi32>
    %146 = arith.cmpi ult, %144, %145 : vector<2x1024xi32>
    %cst_72 = arith.constant 0.000000e+00 : f32
    %147 = vector.broadcast %cst_72 : f32 to vector<2x1024xf32>
    %148 = arith.select %146, %142, %147 : vector<2x1024xi1>, vector<2x1024xf32>
    %c5_73 = arith.constant 5 : index
    %c0_74 = arith.constant 0 : index
    %c0_75 = arith.constant 0 : index
    %149 = vector.load %arg3[%c5_73, %c0_74, %c0_75] : memref<6x2x1024xf32, #tpu.memory_space<vmem>>, vector<1x2x1024xf32>
    %150 = vector.shape_cast %149 : vector<1x2x1024xf32> to vector<2x1024xf32>
    %151 = vector.shape_cast %148 : vector<2x1024xf32> to vector<1x2x1024xf32>
    tpu.vector_store %arg3[%c5_73, %c0_74, %c0_75], %151 {strides = array<i32>} : memref<6x2x1024xf32, #tpu.memory_space<vmem>>, vector<1x2x1024xf32>,
    return
  }
  func.func @transform_0(%arg0: i32, %arg1: memref<6xi32, #tpu.memory_space<smem>>) -> (i32, i32, i32) {
    %c0_i32 = arith.constant 0 : i32
    %c0_i32_0 = arith.constant 0 : i32
    %c0_i32_1 = arith.constant 0 : i32
    return %arg0, %c0_i32, %c0_i32_0 : i32, i32, i32
  }
  func.func @transform_1(%arg0: i32, %arg1: memref<6xi32, #tpu.memory_space<smem>>) -> (i32, i32, i32) {
    %c0_i32 = arith.constant 0 : i32
    %c0_i32_0 = arith.constant 0 : i32
    %c0_i32_1 = arith.constant 0 : i32
    return %arg0, %c0_i32, %c0_i32_0 : i32, i32, i32
  }
}

</mosaic_0001>

<bundles_post_ra>
// kernel: tpu_custom_call.1
= control target key start
LH: loop header
LB: loop body
LE: loop exit
PB: predicated region body
PF: predicated region fallthrough
CT: control target
= control target key end

     0   :  { %s1317_s9 = smov [#allocation3]   ;;  %s2516_s0 = inlined_call_operand.hbm [shape: s32[6], index: 0, kind: input, shape index: {}]   ;;  %s2517_s1 = inlined_call_operand.hbm [shape: f32[6,2,1024], index: 1, kind: input, shape index: {}]   ;;  %s2518_s2 = inlined_call_operand.hbm [shape: f32[6,2,1024], index: 2, kind: output, shape index: {}]  }
   0x1   :  { %8 = dma.hbm_to_smem %s2516_s0, 16, %s1317_s9, [#allocation2] }
   0x2   :  { %1311 = dma.done.wait [#allocation2], 16 }
   0x3   :  { %1312 = vsyncadd [#allocation2], 4294967280 }
   0x4   :  { %10 = sfence }
   0x5   :  { %11 = vsyncpa [#allocation5], 0 }
   0x6   :  { %12 = vsyncpa [#allocation6], 0  ;;  %s1318_s12 = smov [#allocation4]  }
   0x7   :  { %s18_s13 = sshll.u32 %s1318_s12, 4  ;;  %s19_s13 = int_to_ptr.vmem [resolvable:$true] %s18_s13 }
   0x8   :  { %s1279_s14 = scalar_lea.vmem %s19_s13, 1536  ;;  %p1284_p1 = scmp.lt.s32.totalorder %s19_s13, %s19_s13 }
   0x9   :  { %p1280_p0 = scmp.ne.s32.totalorder %s19_s13, %s1279_s14  ;;  %p1285_p2 = scmp.lt.s32.totalorder %s1279_s14, %s1279_s14 }
   0xb   :  { %p1286_p3 = por %p1285_p2, %p1284_p1 }
   0xd   :  { %p1287_p4 = pnand %p1286_p3, %p1280_p0 }
   0xf   :  { %1290 = shalt.err (!%p1287_p4)
}
  0x10   :  { %s1319_s15 = smov 256   ;;  %s1320_s16 = smov 16  }
  0x11   :  { %24 = dma.hbm_to_vmem [thread:$0]  %s2517_s1, 1536, %s19_s13, [#allocation5], %s1319_s15, %s1319_s15, %s1320_s16  }
  0x12   :  { %1313 = dma.done.wait [#allocation5], 1536  }
  0x13   :  { %1314 = vsyncadd [#allocation5], 4294965760  ;;  %s1347_s18 = sld [smem:[#allocation3]]  ;;  %v29_v0 = vlaneseq  ;;  %v1321_v1 = vmov 1983009808   ;;  %v39_v5 = vld [vmem:[#allocation4] sm:$0xff] }
  0x14   :  { %s1349_s19 = sld [smem:[#allocation3 + $0x1]]  ;;  %v57_v2 = vunpack.c.l.s4 %v1321_v1  ;;  %v55_v6 = vcombine.high %v39_v5, %v39_v5  ;;  %v40_v10 = vld [vmem:[#allocation4 + $0x8] sm:$0xff]  ;;  %v233_v17 = vld [vmem:[#allocation4 + $0x10] sm:$0xff]  ;;  %v234_v23 = vld [vmem:[#allocation4 + $0x18] sm:$0xff] }
  0x15   :  { %v60_v4 = vshrl.u32 %v29_v0, 7  ;;  %s1355_s21 = sld [smem:[#allocation3 + $0x2]]  ;;  %v72_v14 = vcombine.high %v40_v10, %v40_v10  ;;  %v249_v20 = vcombine.high %v233_v17, %v233_v17  ;;  %v266_v26 = vcombine.high %v234_v23, %v234_v23  ;;  %v428_v29 = vld [vmem:[#allocation4 + $0x20] sm:$0xff]  ;;  %v429_v35 = vld [vmem:[#allocation4 + $0x28] sm:$0xff]  ;;  %v623_v41 = vld [vmem:[#allocation4 + $0x30] sm:$0xff] }
  0x16   :  { %v58_v3 = vunpack.c.0.s8 %v57_v2  ;;  %s1384_s7 = sld [smem:[#allocation3 + $0x3]]  ;;  %v444_v32 = vcombine.high %v428_v29, %v428_v29  ;;  %v461_v38 = vcombine.high %v429_v35, %v429_v35  ;;  %v639_v44 = vcombine.high %v623_v41, %v623_v41  ;;  %v624_v47 = vld [vmem:[#allocation4 + $0x38] sm:$0xff]  ;;  %v818_v53 = vld [vmem:[#allocation4 + $0x40] sm:$0xff]  ;;  %v819_v59 = vld [vmem:[#allocation4 + $0x48] sm:$0xff] }
  0x17   :  { %s1408_s0 = sld [smem:[#allocation3 + $0x4]]  ;;  %v656_v50 = vcombine.high %v624_v47, %v624_v47  ;;  %v834_v56 = vcombine.high %v818_v53, %v818_v53  ;;  %v851_v62 = vcombine.high %v819_v59, %v819_v59  ;;  %v1013_v2 = vld [vmem:[#allocation4 + $0x50] sm:$0xff] }
  0x18   :  { %v1359_v7 = vsub.s32 %v58_v3, %v60_v4 }
  0x19   :  { %p41_p5 = scmp.lt.s32.totalorder %s1347_s18, 0  ;;  %s42_s20 = ssub.s32 0, %s1347_s18 }
  0x1a   :  { %s1222_s1 = smin.u32 %s42_s20, %s1347_s18  ;;  %s236_s23 = ssub.s32 0, %s1349_s19  ;;  %v69_v8 = vrot.slane %v55_v6, %v1359_v7  ;;  %v62_v9 = vrot.slane %v39_v5, %v1359_v7  ;;  %v79_v11 = vrot.slane %v40_v10, %v1359_v7  ;;  %v86_v16 = vrot.slane %v72_v14, %v1359_v7 }
  0x1b   :  { %s44_s22 = sand.u32 1023, %s1222_s1   ;;  %s1226_s25 = smin.u32 %s1349_s19, %s236_s23  ;;  %v256_v19 = vrot.slane %v233_v17, %v1359_v7  ;;  %v263_v22 = vrot.slane %v249_v20, %v1359_v7  ;;  %v273_v25 = vrot.slane %v234_v23, %v1359_v7  ;;  %v280_v28 = vrot.slane %v266_v26, %v1359_v7 }
  0x1c   :  { %s45_s24 = ssub.s32 0, %s44_s22  ;;  %p235_p6 = scmp.lt.s32.totalorder %s1349_s19, 0  ;;  %v71_v12 = vcombine.high %v69_v8, %v69_v8  ;;  %v70_v13 = vcombine.high %v62_v9, %v62_v9  ;;  %v87_v15 = vcombine.high %v79_v11, %v79_v11  ;;  %v88_v18 = vcombine.high %v86_v16, %v86_v16 }
  0x1d   :  { %s2628_s24 = smov (!%p41_p5, %s45_s24), %s44_s22  ;;  %s238_s26 = sand.u32 1023, %s1226_s25   ;;  %v264_v21 = vcombine.high %v256_v19, %v256_v19  ;;  %v265_v24 = vcombine.high %v263_v22, %v263_v22  ;;  %v281_v27 = vcombine.high %v273_v25, %v273_v25  ;;  %v282_v30 = vcombine.high %v280_v28, %v280_v28 }
  0x1e   :  { %p1224_p7 = scmp.lt.s32.totalorder %s2628_s24, 0  ;;  %s51_s27 = sadd.s32 1024, %s2628_s24  ;;  %v451_v31 = vrot.slane %v428_v29, %v1359_v7  ;;  %v458_v34 = vrot.slane %v444_v32, %v1359_v7  ;;  %v468_v37 = vrot.slane %v429_v35, %v1359_v7  ;;  %v475_v40 = vrot.slane %v461_v38, %v1359_v7 }
  0x1f   :  { %s239_s28 = ssub.s32 0, %s238_s26  ;;  %s431_s3 = ssub.s32 0, %s1355_s21  ;;  %v646_v43 = vrot.slane %v623_v41, %v1359_v7  ;;  %v653_v46 = vrot.slane %v639_v44, %v1359_v7  ;;  %v663_v49 = vrot.slane %v624_v47, %v1359_v7  ;;  %v670_v52 = vrot.slane %v656_v50, %v1359_v7 }
  0x20   :  { %s2630_s27 = smov (!%p1224_p7, %s51_s27), %s2628_s24  ;;  %s2632_s28 = smov (!%p235_p6, %s239_s28), %s238_s26  ;;  %v459_v33 = vcombine.high %v451_v31, %v451_v31  ;;  %v460_v36 = vcombine.high %v458_v34, %v458_v34  ;;  %v476_v39 = vcombine.high %v468_v37, %v468_v37  ;;  %v477_v42 = vcombine.high %v475_v40, %v475_v40 }
  0x21   :  { %s97_s29 = sand.u32 1023, %s2630_s27   ;;  %p1228_p8 = scmp.lt.s32.totalorder %s2632_s28, 0  ;;  %v654_v45 = vcombine.high %v646_v43, %v646_v43  ;;  %v655_v48 = vcombine.high %v653_v46, %v653_v46  ;;  %v671_v51 = vcombine.high %v663_v49, %v663_v49  ;;  %v672_v54 = vcombine.high %v670_v52, %v670_v52 }
  0x22   :  { %s1369_s30 = sand.u32 127, %s97_s29   ;;  %s245_s4 = sadd.s32 1024, %s2632_s28  ;;  %v841_v55 = vrot.slane %v818_v53, %v1359_v7  ;;  %v848_v58 = vrot.slane %v834_v56, %v1359_v7  ;;  %v858_v61 = vrot.slane %v819_v59, %v1359_v7  ;;  %v865_v1 = vrot.slane %v851_v62, %v1359_v7 }
  0x23   :  { %104 = vrot.lane.b32.xlu1 %v69_v8, %s1369_s30  ;;  %100 = vrot.lane.b32.xlu0 %v62_v9, %s1369_s30  ;;  %s1230_s5 = smin.u32 %s1355_s21, %s431_s3  ;;  %s2634_s4 = smov (!%p1228_p8, %s245_s4), %s2632_s28  ;;  %v1036_v4 = vrot.slane %v1013_v2, %v1359_v7  ;;  %v1029_v5 = vcombine.high %v1013_v2, %v1013_v2  ;;  %v1014_v9 = vld [vmem:[#allocation4 + $0x58] sm:$0xff]  ;;  %v116_v17 = vstv %s1369_s30 }
  0x24   :  { %s433_s6 = sand.u32 1023, %s1230_s5   ;;  %s291_s8 = sand.u32 1023, %s2634_s4   ;;  %v849_v57 = vcombine.high %v841_v55, %v841_v55  ;;  %v850_v60 = vcombine.high %v848_v58, %v848_v58  ;;  %v866_v63 = vcombine.high %v858_v61, %v858_v61  ;;  %v867_v3 = vcombine.high %v865_v1, %v865_v1 }
  0x25   :  { %p430_p9 = scmp.lt.s32.totalorder %s1355_s21, 0  ;;  %s434_s9 = ssub.s32 0, %s433_s6  ;;  %v1044_v6 = vcombine.high %v1036_v4, %v1036_v4  ;;  %v1043_v8 = vrot.slane %v1029_v5, %v1359_v7 }
  0x26   :  { %s1393_s10 = sand.u32 127, %s291_s8   ;;  %s626_s11 = ssub.s32 0, %s1384_s7 }
  0x27   :  { %106 = vrot.lane.b32.xlu1 %v71_v12, %s1369_s30  ;;  %102 = vrot.lane.b32.xlu0 %v70_v13, %s1369_s30  ;;  %s2636_s9 = smov (!%p430_p9, %s434_s9), %s433_s6  ;;  %s1234_s13 = smin.u32 %s1384_s7, %s626_s11  ;;  %v1045_v10 = vcombine.high %v1043_v8, %v1043_v8  ;;  %v1046_v12 = vcombine.high %v1014_v9, %v1014_v9  ;;  %v310_v50 = vstv %s1393_s10 }
  0x28   :  { %p1232_p10 = scmp.lt.s32.totalorder %s2636_s9, 0  ;;  %s440_s12 = sadd.s32 1024, %s2636_s9 }
  0x29   :  { %s628_s14 = sand.u32 1023, %s1234_s13   ;;  %p625_p11 = scmp.lt.s32.totalorder %s1384_s7, 0  ;;  %v1060_v14 = vrot.slane %v1046_v12, %v1359_v7 }
  0x2a   :  { %s2638_s12 = smov (!%p1232_p10, %s440_s12), %s2636_s9  ;;  %s629_s20 = ssub.s32 0, %s628_s14 }
  0x2b   :  { %110 = vrot.lane.b32.xlu1 %v87_v15, %s1369_s30  ;;  %108 = vrot.lane.b32.xlu0 %v79_v11, %s1369_s30  ;;  %s486_s17 = sand.u32 1023, %s2638_s12   ;;  %s2640_s20 = smov (!%p625_p11, %s629_s20), %s628_s14  ;;  %v1053_v11 = vrot.slane %v1014_v9, %v1359_v7  ;;  %v1062_v15 = vcombine.high %v1060_v14, %v1060_v14 }
  0x2c   :  { %s1417_s1 = sand.u32 127, %s486_s17   ;;  %p1236_p12 = scmp.lt.s32.totalorder %s2640_s20, 0 }
  0x2d   :  { %s821_s22 = ssub.s32 0, %s1408_s0  ;;  %s635_s23 = sadd.s32 1024, %s2640_s20  ;;  %v1061_v13 = vcombine.high %v1053_v11, %v1053_v11 }
  0x2e   :  { %s1238_s24 = smin.u32 %s1408_s0, %s821_s22  ;;  %s2642_s23 = smov (!%p1236_p12, %s635_s23), %s2640_s20 }
  0x2f   :  { %114 = vrot.lane.b32.xlu1 %v88_v18, %s1369_s30  ;;  %112 = vrot.lane.b32.xlu0 %v86_v16, %s1369_s30  ;;  %s823_s25 = sand.u32 1023, %s1238_s24   ;;  %s1432_s26 = sld [smem:[#allocation3 + $0x5]]  ;;  %v1499_v16 = vand.u32 127, %v29_v0 }
  0x30   :  { %s681_s28 = sand.u32 1023, %s2642_s23   ;;  %p820_p13 = scmp.lt.s32.totalorder %s1408_s0, 0 }
  0x31   :  { %s824_s3 = ssub.s32 0, %s823_s25  ;;  %s1441_s5 = sand.u32 127, %s681_s28   ;;  %v1504_v18 = vadd.s32 128, %v1499_v16  ;;  %v1511_v20 = vadd.s32 384, %v1499_v16  ;;  %v1525_v26 = vadd.s32 768, %v1499_v16  ;;  %vm1533_vm0 = vcmp.lt.s32.totalorder %v1499_v16, %v116_v17 }
  0x32   :  { %s2644_s3 = smov (!%p820_p13, %s824_s3), %s823_s25  ;;  %s1542_s27 = sshrl.u32 %s291_s8, 7  ;;  %vm1637_vm12 = vcmp.lt.s32.totalorder %v1499_v16, %v310_v50 }
  0x33   :  { %296 = vrot.lane.b32.xlu1 %v264_v21, %s1393_s10  ;;  %294 = vrot.lane.b32.xlu0 %v256_v19, %s1393_s10  ;;  %p1240_p0 = scmp.lt.s32.totalorder %s2644_s3, 0  ;;  %s830_s9 = sadd.s32 1024, %s2644_s3  ;;  %v1508_v19 = vadd.s32 256, %v1499_v16  ;;  %v1514_v21 = vadd.s32 512, %v1499_v16 }
  0x34   :  { %s1551_s30 = sshrl.u32 %s486_s17, 7  ;;  %s1588_s8 = sshrl.u32 %s681_s28, 7 }
  0x35   :  { %s1016_s6 = ssub.s32 0, %s1432_s26  ;;  %s2646_s9 = smov (!%p1240_p0, %s830_s9), %s2644_s3 }
  0x36   :  { %s1242_s11 = smin.u32 %s1432_s26, %s1016_s6  ;;  %s876_s14 = sand.u32 1023, %s2646_s9  }
  0x37   :  { %300 = vrot.lane.b32.xlu1 %v265_v24, %s1393_s10  ;;  %298 = vrot.lane.b32.xlu0 %v263_v22, %s1393_s10  ;;  %s1018_s13 = sand.u32 1023, %s1242_s11   ;;  %p1015_p1 = scmp.lt.s32.totalorder %s1432_s26, 0  ;;  %v159_v22 = vstv %s1347_s18 }
  0x38   :  { %s1019_s20 = ssub.s32 0, %s1018_s13  ;;  %s1463_s22 = sand.u32 127, %s876_s14   ;;  %v162_v32 = vsub.s32 %v1508_v19, %v159_v22  ;;  %v166_v38 = vsub.s32 %v1525_v26, %v159_v22 }
  0x39   :  { %s2648_s20 = smov (!%p1015_p1, %s1019_s20), %s1018_s13  ;;  %s1496_s6 = sshrl.u32 %s97_s29, 7 }
  0x3a   :  { %p1244_p2 = scmp.lt.s32.totalorder %s2648_s20, 0  ;;  %s1025_s24 = sadd.s32 1024, %s2648_s20  ;;  %vm1590_vm6 = vcmp.lt.u32.totalorder %v162_v32, 1024  ;;  %vm1613_vm10 = vcmp.lt.u32.totalorder %v166_v38, 1024 }
  0x3b   :  { %304 = vrot.lane.b32.xlu1 %v281_v27, %s1393_s10  ;;  %302 = vrot.lane.b32.xlu0 %v273_v25, %s1393_s10  ;;  %s126_s11 = sand.u32 1, %s1496_s6  ;;  %s148_s13 = sand.u32 4, %s1496_s6  ;;  %v1522_v25 = vadd.s32 640, %v1499_v16  ;;  %v1528_v27 = vadd.s32 896, %v1499_v16 }
  0x3c   :  { %s2650_s24 = smov (!%p1244_p2, %s1025_s24), %s2648_s20  ;;  %v1519_v24 = vstv %s126_s11  ;;  %s137_s18 = sand.u32 2, %s1496_s6 }
  0x3d   :  { %s1071_s25 = sand.u32 1023, %s2650_s24   ;;  %vm128_vm1 = vcmp.ne.s32.totalorder %v1519_v24, 0  ;;  %s342_s29 = sand.u32 4, %s1542_s27  ;;  %v138_v44 = vstv %s137_s18 }
  0x3e   :  { %s1482_s3 = sand.u32 127, %s1071_s25   ;;  %s537_s4 = sand.u32 4, %s1551_s30  ;;  %v1573_v47 = vstv %s342_s29  ;;  %vm139_vm5 = vcmp.ne.s32.totalorder %v138_v44, 0 }
  0x3f   :  { %308 = vrot.lane.b32.xlu1 %v282_v30, %s1393_s10  ;;  %306 = vrot.lane.b32.xlu0 %v280_v28, %s1393_s10  ;;  %v1530_v28 = vstv %s148_s13  ;;  %v160_v30 = vsub.s32 %v1499_v16, %v159_v22  ;;  %s732_s10 = sand.u32 4, %s1588_s8  ;;  %s331_s12 = sand.u32 2, %s1542_s27  ;;  %vm344_vm14 = vcmp.ne.s32.totalorder %v1573_v47, 0 }
  0x40   :  { %vm150_vm2 = vcmp.ne.s32.totalorder %v1530_v28, 0  ;;  %v1645_v12 = vstv %s732_s10  ;;  %s1707_s17 = sshrl.u32 %s876_s14, 7  ;;  %s515_s28 = sand.u32 1, %s1551_s30 }
  0x41   :  { %vm1575_vm3 = vcmp.lt.u32.totalorder %v160_v30, 1024  ;;  %s927_s23 = sand.u32 4, %s1707_s17  ;;  %s1783_s9 = sshrl.u32 %s1071_s25, 7 }
  0x42   :  { %s710_s14 = sand.u32 1, %s1588_s8  ;;  %s721_s20 = sand.u32 2, %s1588_s8 }
  0x43   :  { %491 = vrot.lane.b32.xlu1 %v459_v33, %s1417_s1  ;;  %489 = vrot.lane.b32.xlu0 %v451_v31, %s1417_s1  ;;  %v161_v31 = vsub.s32 %v1504_v18, %v159_v22  ;;  %v163_v33 = vsub.s32 %v1511_v20, %v159_v22 }
  0x45   :  { %vm1579_vm4 = vcmp.lt.u32.totalorder %v161_v31, 1024  ;;  %vm1594_vm7 = vcmp.lt.u32.totalorder %v163_v33, 1024  ;;  %v1659_v31 = vstv %s331_s12 }
  0x47   :  { %495 = vrot.lane.b32.xlu1 %v460_v36, %s1417_s1  ;;  %493 = vrot.lane.b32.xlu0 %v458_v34, %s1417_s1  ;;  %v164_v34 = vsub.s32 %v1514_v21, %v159_v22 }
  0x49   :  { %vm1598_vm8 = vcmp.lt.u32.totalorder %v164_v34, 1024 }
  0x4b   :  { %499 = vrot.lane.b32.xlu1 %v476_v39, %s1417_s1  ;;  %497 = vrot.lane.b32.xlu0 %v468_v37, %s1417_s1  ;;  %v165_v37 = vsub.s32 %v1522_v25, %v159_v22  ;;  %v167_v39 = vsub.s32 %v1528_v27, %v159_v22 }
  0x4d   :  { %vm1602_vm9 = vcmp.lt.u32.totalorder %v165_v37, 1024  ;;  %vm1617_vm11 = vcmp.lt.u32.totalorder %v167_v39, 1024 }
  0x4f   :  { %503 = vrot.lane.b32.xlu1 %v477_v42, %s1417_s1  ;;  %501 = vrot.lane.b32.xlu0 %v475_v40, %s1417_s1  ;;  %v1557_v40 = vstv %s1349_s19  ;;  %s320_s19 = sand.u32 1, %s1542_s27 }
  0x50   :  { %v357_v5 = vsub.s32 %v1511_v20, %v1557_v40  ;;  %v361_v17 = vsub.s32 %v1528_v27, %v1557_v40 }
  0x53   :  { %686 = vrot.lane.b32.xlu1 %v654_v45, %s1441_s5  ;;  %684 = vrot.lane.b32.xlu0 %v646_v43, %s1441_s5 }
  0x57   :  { %690 = vrot.lane.b32.xlu1 %v655_v48, %s1441_s5  ;;  %688 = vrot.lane.b32.xlu0 %v653_v46, %s1441_s5 }
  0x5b   :  { %694 = vrot.lane.b32.xlu1 %v671_v51, %s1441_s5  ;;  %692 = vrot.lane.b32.xlu0 %v663_v49, %s1441_s5  ;;  %v1584_v51 = vstv %s537_s4 }
  0x5f   :  { %698 = vrot.lane.b32.xlu1 %v672_v54, %s1441_s5  ;;  %696 = vrot.lane.b32.xlu0 %v670_v52, %s1441_s5 }
  0x63   :  { %881 = vrot.lane.b32.xlu1 %v849_v57, %s1463_s22  ;;  %879 = vrot.lane.b32.xlu0 %v841_v55, %s1463_s22 }
  0x67   :  { %885 = vrot.lane.b32.xlu1 %v850_v60, %s1463_s22  ;;  %883 = vrot.lane.b32.xlu0 %v848_v58, %s1463_s22  ;;  %v354_v58 = vsub.s32 %v1499_v16, %v1557_v40 }
  0x69   :  { %vm1737_vm15 = vcmp.lt.u32.totalorder %v354_v58, 1024 }
  0x6b   :  { %889 = vrot.lane.b32.xlu1 %v866_v63, %s1463_s22  ;;  %887 = vrot.lane.b32.xlu0 %v858_v61, %s1463_s22  ;;  %v1621_v63 = vstv %s320_s19  ;;  %v1718_v61 = vstv %s1355_s21  ;;  %s526_s21 = sand.u32 2, %s1551_s30 }
  0x6c   :  { %vm322_vm13 = vcmp.ne.s32.totalorder %v1621_v63, 0 }
  0x6f   :  { %893 = vrot.lane.b32.xlu1 %v867_v3, %s1463_s22  ;;  %891 = vrot.lane.b32.xlu0 %v865_v1, %s1463_s22  ;;  %v355_v1 = vsub.s32 %v1504_v18, %v1557_v40 }
  0x73   :  { %1076 = vrot.lane.b32.xlu1 %v1044_v6, %s1482_s3  ;;  %1074 = vrot.lane.b32.xlu0 %v1036_v4, %s1482_s3  ;;  %v356_v4 = vsub.s32 %v1508_v19, %v1557_v40 }
  0x77   :  { %1080 = vrot.lane.b32.xlu1 %v1045_v10, %s1482_s3  ;;  %1078 = vrot.lane.b32.xlu0 %v1043_v8, %s1482_s3  ;;  %v358_v10 = vsub.s32 %v1514_v21, %v1557_v40 }
  0x7b   :  { %1084 = vrot.lane.b32.xlu1 %v1061_v13, %s1482_s3  ;;  %1082 = vrot.lane.b32.xlu0 %v1053_v11, %s1482_s3  ;;  %v359_v11 = vsub.s32 %v1522_v25, %v1557_v40 }
  0x7f   :  { %1088 = vrot.lane.b32.xlu1 %v1062_v15, %s1482_s3  ;;  %1086 = vrot.lane.b32.xlu0 %v1060_v14, %s1482_s3  ;;  %v360_v15 = vsub.s32 %v1525_v26, %v1557_v40 }
  0x95   :  { %v105_v0 = vpop.permute.xlu1 %104  ;;  %v1517_v23 = vpop.permute.xlu0 %100 }
  0x99   :  { %v107_v35 = vpop.permute.xlu1 %106  ;;  %v103_v36 = vpop.permute.xlu0 %102 }
  0x9a   :  { %v122_v41 = vsel %vm1533_vm0, %v105_v0, %v107_v35  ;;  %v123_v42 = vsel %vm1533_vm0, %v103_v36, %v105_v0  ;;  %v124_v43 = vsel %vm1533_vm0, %v1517_v23, %v103_v36 }
  0x9b   :  { %v131_v45 = vsel %vm128_vm1, %v124_v43, %v123_v42  ;;  %v132_v46 = vsel %vm128_vm1, %v123_v42, %v122_v41 }
  0x9d   :  { %v111_v52 = vpop.permute.xlu1 %110  ;;  %v109_v53 = vpop.permute.xlu0 %108 }
  0x9e   :  { %v120_v59 = vsel %vm1533_vm0, %v109_v53, %v111_v52  ;;  %v121_v60 = vsel %vm1533_vm0, %v107_v35, %v109_v53 }
  0x9f   :  { %v133_v2 = vsel %vm128_vm1, %v122_v41, %v121_v60  ;;  %v134_v3 = vsel %vm128_vm1, %v121_v60, %v120_v59 }
  0xa0   :  { %v144_v6 = vsel %vm139_vm5, %v131_v45, %v133_v2  ;;  %v145_v8 = vsel %vm139_vm5, %v132_v46, %v134_v3 }
  0xa1   :  { %v115_v13 = vpop.permute.xlu1 %114  ;;  %v113_v14 = vpop.permute.xlu0 %112 }
  0xa2   :  { %v125_v22 = vsel %vm1533_vm0, %v115_v13, %v1517_v23  ;;  %v118_v0 = vsel %vm1533_vm0, %v113_v14, %v115_v13  ;;  %v119_v30 = vsel %vm1533_vm0, %v111_v52, %v113_v14  ;;  %vm1744_vm0 = vcmp.lt.u32.totalorder %v355_v1, 1024 }
  0xa3   :  { %v130_v32 = vsel %vm128_vm1, %v125_v22, %v124_v43  ;;  %v129_v33 = vsel %vm128_vm1, %v118_v0, %v125_v22  ;;  %v135_v34 = vsel %vm128_vm1, %v120_v59, %v119_v30  ;;  %v136_v23 = vsel %vm128_vm1, %v119_v30, %v118_v0 }
  0xa4   :  { %v143_v35 = vsel %vm139_vm5, %v130_v32, %v132_v46  ;;  %v140_v36 = vsel %vm139_vm5, %v135_v34, %v129_v33  ;;  %v141_v29 = vsel %vm139_vm5, %v136_v23, %v130_v32  ;;  %v142_v37 = vsel %vm139_vm5, %v129_v33, %v131_v45 }
  0xa5   :  { %v146_v38 = vsel %vm139_vm5, %v133_v2, %v135_v34  ;;  %v147_v39 = vsel %vm139_vm5, %v134_v3, %v136_v23  ;;  %v151_v41 = vsel %vm150_vm2, %v144_v6, %v140_v36  ;;  %v152_v24 = vsel %vm150_vm2, %v145_v8, %v141_v29  ;;  %v297_v42 = vpop.permute.xlu1 %296  ;;  %v1679_v43 = vpop.permute.xlu0 %294 }
  0xa6   :  { %v153_v46 = vsel %vm150_vm2, %v146_v38, %v142_v37  ;;  %v154_v45 = vsel %vm150_vm2, %v147_v39, %v143_v35  ;;  %v155_v44 = vsel %vm150_vm2, %v140_v36, %v144_v6  ;;  %v156_v50 = vsel %vm150_vm2, %v141_v29, %v145_v8 }
  0xa7   :  { %v157_v52 = vsel %vm150_vm2, %v142_v37, %v146_v38  ;;  %v158_v53 = vsel %vm150_vm2, %v143_v35, %v147_v39  ;;  %v176_v59 = vsel %vm1575_vm3, %v151_v41, 0.0  ;;  %v177_v60 = vsel %vm1579_vm4, %v152_v24, 0.0 }
  0xa8   :  { %v178_v2 = vsel %vm1590_vm6, %v153_v46, 0.0  ;;  %v179_v3 = vsel %vm1594_vm7, %v154_v45, 0.0  ;;  %v180_v6 = vsel %vm1598_vm8, %v155_v44, 0.0  ;;  %v181_v28 = vsel %vm1602_vm9, %v156_v50, 0.0 }
  0xa9   :  { %v182_v48 = vsel %vm1613_vm10, %v157_v52, 0.0  ;;  %v183_v49 = vsel %vm1617_vm11, %v158_v53, 0.0  ;;  %v192_v54 = vcombine.low %v176_v59, %v177_v60  ;;  %v193_v55 = vcombine.low %v178_v2, %v179_v3  ;;  %v301_v8 = vpop.permute.xlu1 %300  ;;  %v299_v13 = vpop.permute.xlu0 %298 }
  0xaa   :  { %v209_v56 = vcombine.low %v180_v6, %v181_v28  ;;  %v210_v57 = vcombine.low %v182_v48, %v183_v49  ;;  %v316_v14 = vsel %vm1637_vm12, %v299_v13, %v301_v8  ;;  %v318_v0 = vsel %vm1637_vm12, %v1679_v43, %v297_v42 }
  0xab   :  { %v200_v22 = vrot.slane %v192_v54, %v1359_v7  ;;  %v207_v62 = vrot.slane %v193_v55, %v1359_v7  ;;  %v317_v30 = vsel %vm1637_vm12, %v297_v42, %v299_v13  ;;  %v1749_v29 = vstv %s927_s23 }
  0xac   :  { %v217_v32 = vrot.slane %v209_v56, %v1359_v7  ;;  %v224_v33 = vrot.slane %v210_v57, %v1359_v7  ;;  %v325_v34 = vsel %vm322_vm13, %v318_v0, %v317_v30  ;;  %v326_v23 = vsel %vm322_vm13, %v317_v30, %v316_v14 }
  0xad   :  { %v208_v37 = vcombine.low %v200_v22, %v207_v62  ;;  %v305_v38 = vpop.permute.xlu1 %304  ;;  %vm333_vm1 = vcmp.ne.s32.totalorder %v1659_v31, 0  ;;  %v303_v39 = vpop.permute.xlu0 %302  ;;  %vm1755_vm2 = vcmp.lt.u32.totalorder %v356_v4, 1024  ;;  %vm1762_vm3 = vcmp.lt.u32.totalorder %v357_v5, 1024 }
  0xae   :  { %vm1769_vm4 = vcmp.lt.u32.totalorder %v358_v10, 1024  ;;  %vm1776_vm5 = vcmp.lt.u32.totalorder %v359_v11, 1024  ;;  %v505_v24 = vstv %s1417_s1  ;;  %v225_v5 = vcombine.low %v217_v32, %v224_v33  ;;  %s1122_s1 = sand.u32 4, %s1783_s9 }
  0xaf   :  { %v314_v42 = vsel %vm1637_vm12, %v303_v39, %v305_v38  ;;  %v315_v10 = vsel %vm1637_vm12, %v301_v8, %v303_v39  ;;  %vm1792_vm6 = vcmp.lt.u32.totalorder %v360_v15, 1024  ;;  %vm1799_vm7 = vcmp.lt.u32.totalorder %v361_v17, 1024  ;;  %228 = vst [vmem:[#allocation7] sm:$0xff] %v208_v37 }
  0xb0   :  { %v1803_v45 = vstv %s515_s28  ;;  %v327_v44 = vsel %vm322_vm13, %v316_v14, %v315_v10  ;;  %v328_v15 = vsel %vm322_vm13, %v315_v10, %v314_v42  ;;  %v1810_v50 = vstv %s526_s21  ;;  %229 = vst [vmem:[#allocation7 + $0x8] sm:$0xff] %v225_v5 }
  0xb1   :  { %v549_v52 = vsub.s32 %v1499_v16, %v1718_v61  ;;  %v338_v40 = vsel %vm333_vm1, %v325_v34, %v327_v44  ;;  %v339_v17 = vsel %vm333_vm1, %v326_v23, %v328_v15  ;;  %vm1819_vm8 = vcmp.lt.s32.totalorder %v1499_v16, %v505_v24  ;;  %v309_v2 = vpop.permute.xlu1 %308  ;;  %v307_v3 = vpop.permute.xlu0 %306 }
  0xb2   :  { %v550_v59 = vsub.s32 %v1504_v18, %v1718_v61  ;;  %v551_v60 = vsub.s32 %v1508_v19, %v1718_v61  ;;  %vm517_vm9 = vcmp.ne.s32.totalorder %v1803_v45, 0  ;;  %v552_v6 = vsub.s32 %v1511_v20, %v1718_v61 }
  0xb3   :  { %v553_v28 = vsub.s32 %v1514_v21, %v1718_v61  ;;  %v554_v48 = vsub.s32 %v1522_v25, %v1718_v61  ;;  %v555_v49 = vsub.s32 %v1525_v26, %v1718_v61  ;;  %v1836_v54 = vstv %s1122_s1 }
  0xb4   :  { %v319_v55 = vsel %vm1637_vm12, %v309_v2, %v1679_v43  ;;  %v312_v8 = vsel %vm1637_vm12, %v307_v3, %v309_v2  ;;  %v313_v13 = vsel %vm1637_vm12, %v305_v38, %v307_v3  ;;  %vm528_vm10 = vcmp.ne.s32.totalorder %v1810_v50, 0 }
  0xb5   :  { %v324_v56 = vsel %vm322_vm13, %v319_v55, %v318_v0  ;;  %v323_v57 = vsel %vm322_vm13, %v312_v8, %v319_v55  ;;  %v329_v14 = vsel %vm322_vm13, %v314_v42, %v313_v13  ;;  %v330_v22 = vsel %vm322_vm13, %v313_v13, %v312_v8  ;;  %v1869_v37 = vpop.permute.xlu0 %489 }
  0xb6   :  { %v337_v43 = vsel %vm333_vm1, %v324_v56, %v326_v23  ;;  %v334_v62 = vsel %vm333_vm1, %v329_v14, %v323_v57  ;;  %v335_v9 = vsel %vm333_vm1, %v330_v22, %v324_v56  ;;  %v336_v0 = vsel %vm333_vm1, %v323_v57, %v325_v34  ;;  %v492_v23 = vpop.permute.xlu1 %491 }
  0xb7   :  { %v340_v30 = vsel %vm333_vm1, %v327_v44, %v329_v14  ;;  %v341_v32 = vsel %vm333_vm1, %v328_v15, %v330_v22  ;;  %v345_v63 = vsel %vm344_vm14, %v338_v40, %v334_v62  ;;  %v346_v33 = vsel %vm344_vm14, %v339_v17, %v335_v9 }
  0xb8   :  { %v347_v34 = vsel %vm344_vm14, %v340_v30, %v336_v0  ;;  %v348_v38 = vsel %vm344_vm14, %v341_v32, %v337_v43  ;;  %v349_v31 = vsel %vm344_vm14, %v334_v62, %v338_v40  ;;  %v350_v39 = vsel %vm344_vm14, %v335_v9, %v339_v17 }
  0xb9   :  { %v351_v24 = vsel %vm344_vm14, %v336_v0, %v340_v30  ;;  %v352_v5 = vsel %vm344_vm14, %v337_v43, %v341_v32  ;;  %v370_v42 = vsel %vm1737_vm15, %v345_v63, 0.0  ;;  %v371_v10 = vsel %vm1744_vm0, %v346_v33, 0.0  ;;  %v494_v3 = vpop.permute.xlu0 %493 }
  0xba   :  { %v372_v44 = vsel %vm1755_vm2, %v347_v34, 0.0  ;;  %v373_v15 = vsel %vm1762_vm3, %v348_v38, 0.0  ;;  %v374_v40 = vsel %vm1769_vm4, %v349_v31, 0.0  ;;  %v375_v17 = vsel %vm1776_vm5, %v350_v39, 0.0  ;;  %v496_v58 = vpop.permute.xlu1 %495 }
  0xbb   :  { %v376_v47 = vsel %vm1792_vm6, %v351_v24, 0.0  ;;  %v377_v35 = vsel %vm1799_vm7, %v352_v5, 0.0  ;;  %v386_v36 = vcombine.low %v370_v42, %v371_v10  ;;  %v387_v2 = vcombine.low %v372_v44, %v373_v15 }
  0xbc   :  { %v403_v55 = vcombine.low %v374_v40, %v375_v17  ;;  %v404_v1 = vcombine.low %v376_v47, %v377_v35  ;;  %v511_v41 = vsel %vm1819_vm8, %v494_v3, %v496_v58  ;;  %vm539_vm11 = vcmp.ne.s32.totalorder %v1584_v51, 0 }
  0xbd   :  { %v556_v4 = vsub.s32 %v1528_v27, %v1718_v61  ;;  %v394_v11 = vrot.slane %v386_v36, %v1359_v7  ;;  %v401_v46 = vrot.slane %v387_v2, %v1359_v7  ;;  %v513_v8 = vsel %vm1819_vm8, %v1869_v37, %v492_v23  ;;  %v498_v30 = vpop.permute.xlu0 %497 }
  0xbe   :  { %v512_v13 = vsel %vm1819_vm8, %v492_v23, %v494_v3  ;;  %v411_v56 = vrot.slane %v403_v55, %v1359_v7  ;;  %v418_v57 = vrot.slane %v404_v1, %v1359_v7  ;;  %vm1922_vm12 = vcmp.lt.u32.totalorder %v549_v52, 1024  ;;  %v500_v0 = vpop.permute.xlu1 %499 }
  0xbf   :  { %v520_v14 = vsel %vm517_vm9, %v513_v8, %v512_v13  ;;  %v521_v22 = vsel %vm517_vm9, %v512_v13, %v511_v41  ;;  %vm1926_vm13 = vcmp.lt.u32.totalorder %v550_v59, 1024  ;;  %v402_v9 = vcombine.low %v394_v11, %v401_v46 }
  0xc0   :  { %vm1934_vm14 = vcmp.lt.u32.totalorder %v551_v60, 1024  ;;  %vm1938_vm15 = vcmp.lt.u32.totalorder %v552_v6, 1024  ;;  %vm1942_vm0 = vcmp.lt.u32.totalorder %v553_v28, 1024  ;;  %vm1946_vm1 = vcmp.lt.u32.totalorder %v554_v48, 1024 }
  0xc1   :  { %v700_v33 = vstv %s1441_s5  ;;  %v1952_v23 = vstv %s1384_s7  ;;  %v419_v34 = vcombine.low %v411_v56, %v418_v57  ;;  %v509_v60 = vsel %vm1819_vm8, %v498_v30, %v500_v0  ;;  %423 = vst [vmem:[#allocation7 + $0x10] sm:$0xff] %v402_v9  ;;  %v502_v15 = vpop.permute.xlu0 %501  ;;  %s905_s7 = sand.u32 1, %s1707_s17  ;;  %s916_s5 = sand.u32 2, %s1707_s17 }
  0xc2   :  { %v510_v6 = vsel %vm1819_vm8, %v496_v58, %v498_v30  ;;  %vm1961_vm2 = vcmp.lt.u32.totalorder %v555_v49, 1024  ;;  %v1965_v48 = vstv %s710_s14  ;;  %vm1971_vm3 = vcmp.lt.u32.totalorder %v556_v4, 1024  ;;  %v504_v44 = vpop.permute.xlu1 %503 }
  0xc3   :  { %v522_v38 = vsel %vm517_vm9, %v511_v41, %v510_v6  ;;  %v523_v31 = vsel %vm517_vm9, %v510_v6, %v509_v60  ;;  %v1975_v24 = vstv %s721_s20  ;;  %424 = vst [vmem:[#allocation7 + $0x18] sm:$0xff] %v419_v34  ;;  %vm1982_vm4 = vcmp.lt.s32.totalorder %v1499_v16, %v700_v33 }
  0xc4   :  { %v533_v61 = vsel %vm528_vm10, %v520_v14, %v522_v38  ;;  %v534_v49 = vsel %vm528_vm10, %v521_v22, %v523_v31  ;;  %v744_v42 = vsub.s32 %v1499_v16, %v1952_v23  ;;  %v745_v10 = vsub.s32 %v1504_v18, %v1952_v23 }
  0xc5   :  { %vm712_vm5 = vcmp.ne.s32.totalorder %v1965_v48, 0  ;;  %v746_v40 = vsub.s32 %v1508_v19, %v1952_v23  ;;  %v747_v17 = vsub.s32 %v1511_v20, %v1952_v23  ;;  %v748_v47 = vsub.s32 %v1514_v21, %v1952_v23 }
  0xc6   :  { %v749_v35 = vsub.s32 %v1522_v25, %v1952_v23  ;;  %v514_v36 = vsel %vm1819_vm8, %v504_v44, %v1869_v37  ;;  %v507_v2 = vsel %vm1819_vm8, %v502_v15, %v504_v44  ;;  %v508_v58 = vsel %vm1819_vm8, %v500_v0, %v502_v15  ;;  %v687_v57 = vpop.permute.xlu1 %686 }
  0xc7   :  { %v750_v3 = vsub.s32 %v1525_v26, %v1952_v23  ;;  %v519_v55 = vsel %vm517_vm9, %v514_v36, %v513_v8  ;;  %v518_v1 = vsel %vm517_vm9, %v507_v2, %v514_v36  ;;  %v524_v41 = vsel %vm517_vm9, %v509_v60, %v508_v58 }
  0xc8   :  { %v525_v37 = vsel %vm517_vm9, %v508_v58, %v507_v2  ;;  %v532_v4 = vsel %vm528_vm10, %v519_v55, %v521_v22  ;;  %v529_v53 = vsel %vm528_vm10, %v524_v41, %v518_v1  ;;  %v531_v46 = vsel %vm528_vm10, %v518_v1, %v520_v14  ;;  %v2032_v22 = vpop.permute.xlu0 %684 }
  0xc9   :  { %v530_v11 = vsel %vm528_vm10, %v525_v37, %v519_v55  ;;  %v535_v8 = vsel %vm528_vm10, %v522_v38, %v524_v41  ;;  %v536_v13 = vsel %vm528_vm10, %v523_v31, %v525_v37  ;;  %v540_v45 = vsel %vm539_vm11, %v533_v61, %v529_v53 }
  0xca   :  { %v541_v56 = vsel %vm539_vm11, %v534_v49, %v530_v11  ;;  %vm723_vm6 = vcmp.ne.s32.totalorder %v1975_v24, 0  ;;  %v542_v14 = vsel %vm539_vm11, %v535_v8, %v531_v46  ;;  %v543_v9 = vsel %vm539_vm11, %v536_v13, %v532_v4  ;;  %v691_v32 = vpop.permute.xlu1 %690 }
  0xcb   :  { %v544_v50 = vsel %vm539_vm11, %v529_v53, %v533_v61  ;;  %v545_v0 = vsel %vm539_vm11, %v530_v11, %v534_v49  ;;  %v546_v30 = vsel %vm539_vm11, %v531_v46, %v535_v8  ;;  %v547_v33 = vsel %vm539_vm11, %v532_v4, %v536_v13 }
  0xcc   :  { %v565_v34 = vsel %vm1922_vm12, %v540_v45, 0.0  ;;  %v566_v60 = vsel %vm1926_vm13, %v541_v56, 0.0  ;;  %v567_v6 = vsel %vm1934_vm14, %v542_v14, 0.0  ;;  %v568_v38 = vsel %vm1938_vm15, %v543_v9, 0.0  ;;  %v689_v44 = vpop.permute.xlu0 %688 }
  0xcd   :  { %v569_v31 = vsel %vm1942_vm0, %v544_v50, 0.0  ;;  %v570_v61 = vsel %vm1946_vm1, %v545_v0, 0.0  ;;  %v571_v51 = vsel %vm1961_vm2, %v546_v30, 0.0  ;;  %v572_v43 = vsel %vm1971_vm3, %v547_v33, 0.0 }
  0xce   :  { %v581_v62 = vcombine.low %v565_v34, %v566_v60  ;;  %v582_v49 = vcombine.low %v567_v6, %v568_v38  ;;  %v598_v15 = vcombine.low %v569_v31, %v570_v61  ;;  %v599_v52 = vcombine.low %v571_v51, %v572_v43  ;;  %v695_v11 = vpop.permute.xlu1 %694 }
  0xcf   :  { %v706_v59 = vsel %vm1982_vm4, %v689_v44, %v691_v32  ;;  %vm734_vm7 = vcmp.ne.s32.totalorder %v1645_v12, 0  ;;  %v751_v63 = vsub.s32 %v1528_v27, %v1952_v23  ;;  %v708_v36 = vsel %vm1982_vm4, %v2032_v22, %v687_v57 }
  0xd0   :  { %v589_v28 = vrot.slane %v581_v62, %v1359_v7  ;;  %v596_v39 = vrot.slane %v582_v49, %v1359_v7  ;;  %v707_v2 = vsel %vm1982_vm4, %v687_v57, %v689_v44  ;;  %v606_v58 = vrot.slane %v598_v15, %v1359_v7  ;;  %v693_v46 = vpop.permute.xlu0 %692 }
  0xd1   :  { %v613_v55 = vrot.slane %v599_v52, %v1359_v7  ;;  %v715_v1 = vsel %vm712_vm5, %v708_v36, %v707_v2  ;;  %v716_v41 = vsel %vm712_vm5, %v707_v2, %v706_v59  ;;  %vm2082_vm8 = vcmp.lt.u32.totalorder %v744_v42, 1024 }
  0xd2   :  { %vm2086_vm9 = vcmp.lt.u32.totalorder %v745_v10, 1024  ;;  %v597_v53 = vcombine.low %v589_v28, %v596_v39  ;;  %vm2091_vm10 = vcmp.lt.u32.totalorder %v746_v40, 1024  ;;  %vm2095_vm11 = vcmp.lt.u32.totalorder %v747_v17, 1024  ;;  %v699_v60 = vpop.permute.xlu1 %698 }
  0xd3   :  { %vm2099_vm12 = vcmp.lt.u32.totalorder %v748_v47, 1024  ;;  %vm2103_vm13 = vcmp.lt.u32.totalorder %v749_v35, 1024  ;;  %v895_v45 = vstv %s1463_s22  ;;  %v2109_v56 = vstv %s1408_s0  ;;  %s1100_s0 = sand.u32 1, %s1783_s9  ;;  %s1111_s22 = sand.u32 2, %s1783_s9 }
  0xd4   :  { %v614_v57 = vcombine.low %v606_v58, %v613_v55  ;;  %v704_v40 = vsel %vm1982_vm4, %v693_v46, %v695_v11  ;;  %v705_v17 = vsel %vm1982_vm4, %v691_v32, %v693_v46  ;;  %vm2118_vm14 = vcmp.lt.u32.totalorder %v750_v3, 1024  ;;  %618 = vst [vmem:[#allocation7 + $0x20] sm:$0xff] %v597_v53  ;;  %v697_v6 = vpop.permute.xlu0 %696 }
  0xd5   :  { %v2122_v35 = vstv %s905_s7  ;;  %v717_v14 = vsel %vm712_vm5, %v706_v59, %v705_v17  ;;  %v718_v9 = vsel %vm712_vm5, %v705_v17, %v704_v40  ;;  %vm2128_vm15 = vcmp.lt.u32.totalorder %v751_v63, 1024 }
  0xd6   :  { %v2132_v0 = vstv %s916_s5  ;;  %619 = vst [vmem:[#allocation7 + $0x28] sm:$0xff] %v614_v57  ;;  %v728_v23 = vsel %vm723_vm6, %v715_v1, %v717_v14  ;;  %v729_v3 = vsel %vm723_vm6, %v716_v41, %v718_v9  ;;  %vm2139_vm0 = vcmp.lt.s32.totalorder %v1499_v16, %v895_v45  ;;  %v882_v58 = vpop.permute.xlu1 %881 }
  0xd7   :  { %v939_v33 = vsub.s32 %v1499_v16, %v2109_v56  ;;  %v940_v34 = vsub.s32 %v1504_v18, %v2109_v56  ;;  %vm907_vm1 = vcmp.ne.s32.totalorder %v2122_v35, 0  ;;  %v941_v38 = vsub.s32 %v1508_v19, %v2109_v56 }
  0xd8   :  { %v942_v31 = vsub.s32 %v1511_v20, %v2109_v56  ;;  %v943_v61 = vsub.s32 %v1514_v21, %v2109_v56  ;;  %v944_v51 = vsub.s32 %v1522_v25, %v2109_v56  ;;  %v709_v43 = vsel %vm1982_vm4, %v699_v60, %v2032_v22  ;;  %v2189_v55 = vpop.permute.xlu0 %879 }
  0xd9   :  { %v702_v62 = vsel %vm1982_vm4, %v697_v6, %v699_v60  ;;  %v703_v49 = vsel %vm1982_vm4, %v695_v11, %v697_v6  ;;  %v945_v32 = vsub.s32 %v1525_v26, %v2109_v56  ;;  %v714_v44 = vsel %vm712_vm5, %v709_v43, %v708_v36 }
  0xda   :  { %v713_v15 = vsel %vm712_vm5, %v702_v62, %v709_v43  ;;  %v719_v52 = vsel %vm712_vm5, %v704_v40, %v703_v49  ;;  %v720_v22 = vsel %vm712_vm5, %v703_v49, %v702_v62  ;;  %v727_v59 = vsel %vm723_vm6, %v714_v44, %v716_v41  ;;  %v886_v8 = vpop.permute.xlu1 %885 }
  0xdb   :  { %v724_v5 = vsel %vm723_vm6, %v719_v52, %v713_v15  ;;  %v725_v63 = vsel %vm723_vm6, %v720_v22, %v714_v44  ;;  %v726_v28 = vsel %vm723_vm6, %v713_v15, %v715_v1  ;;  %v730_v39 = vsel %vm723_vm6, %v717_v14, %v719_v52 }
  0xdc   :  { %v731_v36 = vsel %vm723_vm6, %v718_v9, %v720_v22  ;;  %v735_v48 = vsel %vm734_vm7, %v728_v23, %v724_v5  ;;  %v736_v2 = vsel %vm734_vm7, %v729_v3, %v725_v63  ;;  %vm918_vm2 = vcmp.ne.s32.totalorder %v2132_v0, 0 }
  0xdd   :  { %v737_v1 = vsel %vm734_vm7, %v730_v39, %v726_v28  ;;  %v738_v41 = vsel %vm734_vm7, %v731_v36, %v727_v59  ;;  %v739_v24 = vsel %vm734_vm7, %v724_v5, %v728_v23  ;;  %v740_v53 = vsel %vm734_vm7, %v725_v63, %v729_v3  ;;  %v884_v3 = vpop.permute.xlu0 %883 }
  0xde   :  { %v741_v11 = vsel %vm734_vm7, %v726_v28, %v730_v39  ;;  %v742_v46 = vsel %vm734_vm7, %v727_v59, %v731_v36  ;;  %v760_v45 = vsel %vm2082_vm8, %v735_v48, 0.0  ;;  %v761_v57 = vsel %vm2086_vm9, %v736_v2, 0.0  ;;  %v890_v5 = vpop.permute.xlu1 %889 }
  0xdf   :  { %v762_v40 = vsel %vm2091_vm10, %v737_v1, 0.0  ;;  %v763_v17 = vsel %vm2095_vm11, %v738_v41, 0.0  ;;  %v764_v14 = vsel %vm2099_vm12, %v739_v24, 0.0  ;;  %v765_v12 = vsel %vm2103_vm13, %v740_v53, 0.0 }
  0xe0   :  { %v766_v37 = vsel %vm2118_vm14, %v741_v11, 0.0  ;;  %v767_v4 = vsel %vm2128_vm15, %v742_v46, 0.0  ;;  %v776_v9 = vcombine.low %v760_v45, %v761_v57  ;;  %v777_v23 = vcombine.low %v762_v40, %v763_v17 }
  0xe1   :  { %v793_v60 = vcombine.low %v764_v14, %v765_v12  ;;  %v794_v6 = vcombine.low %v766_v37, %v767_v4  ;;  %v901_v13 = vsel %vm2139_vm0, %v884_v3, %v886_v8  ;;  %vm929_vm3 = vcmp.ne.s32.totalorder %v1749_v29, 0  ;;  %v888_v63 = vpop.permute.xlu0 %887 }
  0xe2   :  { %v946_v42 = vsub.s32 %v1528_v27, %v2109_v56  ;;  %v784_v10 = vrot.slane %v776_v9, %v1359_v7  ;;  %v791_v47 = vrot.slane %v777_v23, %v1359_v7  ;;  %v903_v50 = vsel %vm2139_vm0, %v2189_v55, %v882_v58  ;;  %v894_v56 = vpop.permute.xlu1 %893 }
  0xe3   :  { %v902_v43 = vsel %vm2139_vm0, %v882_v58, %v884_v3  ;;  %v801_v62 = vrot.slane %v793_v60, %v1359_v7  ;;  %v808_v49 = vrot.slane %v794_v6, %v1359_v7  ;;  %vm2239_vm4 = vcmp.lt.u32.totalorder %v939_v33, 1024 }
  0xe4   :  { %v910_v44 = vsel %vm907_vm1, %v903_v50, %v902_v43  ;;  %v911_v15 = vsel %vm907_vm1, %v902_v43, %v901_v13  ;;  %vm2243_vm5 = vcmp.lt.u32.totalorder %v940_v34, 1024  ;;  %v792_v59 = vcombine.low %v784_v10, %v791_v47 }
  0xe5   :  { %vm2247_vm6 = vcmp.lt.u32.totalorder %v941_v38, 1024  ;;  %vm2251_vm7 = vcmp.lt.u32.totalorder %v942_v31, 1024  ;;  %vm2255_vm8 = vcmp.lt.u32.totalorder %v943_v61, 1024  ;;  %v1090_v36 = vstv %s1482_s3 }
  0xe6   :  { %v2260_v34 = vstv %s1100_s0  ;;  %v809_v48 = vcombine.low %v801_v62, %v808_v49  ;;  %v899_v2 = vsel %vm2139_vm0, %v888_v63, %v890_v5  ;;  %v900_v38 = vsel %vm2139_vm0, %v886_v8, %v888_v63  ;;  %813 = vst [vmem:[#allocation7 + $0x30] sm:$0xff] %v792_v59 }
  0xe7   :  { %v2268_v58 = vstv %s1432_s26  ;;  %v912_v31 = vsel %vm907_vm1, %v901_v13, %v900_v38  ;;  %v913_v61 = vsel %vm907_vm1, %v900_v38, %v899_v2  ;;  %vm2277_vm9 = vcmp.lt.u32.totalorder %v944_v51, 1024  ;;  %s1322_s26 = smov [#allocation7]  }
  0xe8   :  { %vm2284_vm10 = vcmp.lt.u32.totalorder %v945_v32, 1024  ;;  %814 = vst [vmem:[#allocation7 + $0x38] sm:$0xff] %v809_v48  ;;  %v923_v24 = vsel %vm918_vm2, %v910_v44, %v912_v31  ;;  %v924_v53 = vsel %vm918_vm2, %v911_v15, %v913_v61  ;;  %vm2292_vm11 = vcmp.lt.u32.totalorder %v946_v42, 1024  ;;  %v892_v32 = vpop.permute.xlu0 %891  ;;  %v1077_v42 = vpop.permute.xlu1 %1076  ;;  %s1210_s24 = sshll.u32 %s1322_s26, 4  ;;  %s1211_s24 = int_to_ptr.vmem [resolvable:$true] %s1210_s24 }
  0xe9   :  { %vm2297_vm12 = vcmp.lt.s32.totalorder %v1499_v16, %v1090_v36  ;;  %vm1102_vm13 = vcmp.ne.s32.totalorder %v2260_v34, 0  ;;  %v2302_v46 = vstv %s1111_s22  ;;  %v1134_v45 = vsub.s32 %v1499_v16, %v2268_v58  ;;  %s1291_s25 = scalar_lea.vmem %s1211_s24, 1536  ;;  %p1296_p4 = scmp.lt.s32.totalorder %s1211_s24, %s1211_s24 }
  0xea   :  { %v1135_v57 = vsub.s32 %v1504_v18, %v2268_v58  ;;  %v904_v40 = vsel %vm2139_vm0, %v894_v56, %v2189_v55  ;;  %v897_v17 = vsel %vm2139_vm0, %v892_v32, %v894_v56  ;;  %v898_v14 = vsel %vm2139_vm0, %v890_v5, %v892_v32  ;;  %p1292_p3 = scmp.ne.s32.totalorder %s1211_s24, %s1291_s25  ;;  %p1297_p5 = scmp.lt.s32.totalorder %s1291_s25, %s1291_s25 }
  0xeb   :  { %v1136_v12 = vsub.s32 %v1508_v19, %v2268_v58  ;;  %v909_v37 = vsel %vm907_vm1, %v904_v40, %v903_v50  ;;  %v908_v4 = vsel %vm907_vm1, %v897_v17, %v904_v40  ;;  %v914_v9 = vsel %vm907_vm1, %v899_v2, %v898_v14 }
  0xec   :  { %v915_v55 = vsel %vm907_vm1, %v898_v14, %v897_v17  ;;  %v922_v23 = vsel %vm918_vm2, %v909_v37, %v911_v15  ;;  %v919_v30 = vsel %vm918_vm2, %v914_v9, %v908_v4  ;;  %v921_v3 = vsel %vm918_vm2, %v908_v4, %v910_v44  ;;  %v1075_v10 = vpop.permute.xlu0 %1074  ;;  %v1081_v2 = vpop.permute.xlu1 %1080  ;;  %p1298_p6 = por %p1297_p5, %p1296_p4 }
  0xed   :  { %v920_v8 = vsel %vm918_vm2, %v915_v55, %v909_v37  ;;  %v925_v60 = vsel %vm918_vm2, %v912_v31, %v914_v9  ;;  %v926_v6 = vsel %vm918_vm2, %v913_v61, %v915_v55  ;;  %v930_v35 = vsel %vm929_vm3, %v923_v24, %v919_v30 }
  0xee   :  { %v931_v13 = vsel %vm929_vm3, %v924_v53, %v920_v8  ;;  %vm1113_vm14 = vcmp.ne.s32.totalorder %v2302_v46, 0  ;;  %v932_v47 = vsel %vm929_vm3, %v925_v60, %v921_v3  ;;  %v933_v50 = vsel %vm929_vm3, %v926_v6, %v922_v23  ;;  %p1299_p7 = pnand %p1298_p6, %p1292_p3 }
  0xef   :  { %v934_v0 = vsel %vm929_vm3, %v919_v30, %v923_v24  ;;  %v935_v43 = vsel %vm929_vm3, %v920_v8, %v924_v53  ;;  %v936_v62 = vsel %vm929_vm3, %v921_v3, %v925_v60  ;;  %v937_v49 = vsel %vm929_vm3, %v922_v23, %v926_v6 }
  0xf0   :  { %v955_v44 = vsel %vm2239_vm4, %v930_v35, 0.0  ;;  %v956_v15 = vsel %vm2243_vm5, %v931_v13, 0.0  ;;  %v957_v59 = vsel %vm2247_vm6, %v932_v47, 0.0  ;;  %v958_v5 = vsel %vm2251_vm7, %v933_v50, 0.0  ;;  %v1079_v28 = vpop.permute.xlu0 %1078  ;;  %v1085_v40 = vpop.permute.xlu1 %1084 }
  0xf1   :  { %v959_v63 = vsel %vm2255_vm8, %v934_v0, 0.0  ;;  %v960_v36 = vsel %vm2277_vm9, %v935_v43, 0.0  ;;  %v961_v29 = vsel %vm2284_vm10, %v936_v62, 0.0  ;;  %v962_v52 = vsel %vm2292_vm11, %v937_v49, 0.0 }
  0xf2   :  { %v971_v22 = vcombine.low %v955_v44, %v956_v15  ;;  %v972_v48 = vcombine.low %v957_v59, %v958_v5  ;;  %v988_v38 = vcombine.low %v959_v63, %v960_v36  ;;  %v989_v31 = vcombine.low %v961_v29, %v962_v52 }
  0xf3   :  { %v1096_v39 = vsel %vm2297_vm12, %v1079_v28, %v1081_v2  ;;  %v1137_v33 = vsub.s32 %v1511_v20, %v2268_v58  ;;  %v1098_v41 = vsel %vm2297_vm12, %v1075_v10, %v1077_v42  ;;  %v1097_v24 = vsel %vm2297_vm12, %v1077_v42, %v1079_v28 }
  0xf4   :  { %v979_v61 = vrot.slane %v971_v22, %v1359_v7  ;;  %v986_v1 = vrot.slane %v972_v48, %v1359_v7  ;;  %v996_v53 = vrot.slane %v988_v38, %v1359_v7  ;;  %v1003_v11 = vrot.slane %v989_v31, %v1359_v7  ;;  %v1083_v17 = vpop.permute.xlu0 %1082 }
  0xf5   :  { %v1105_v56 = vsel %vm1102_vm13, %v1098_v41, %v1097_v24  ;;  %v1106_v20 = vsel %vm1102_vm13, %v1097_v24, %v1096_v39  ;;  %v1138_v14 = vsub.s32 %v1514_v21, %v2268_v58  ;;  %v1139_v37 = vsub.s32 %v1522_v25, %v2268_v58 }
  0xf6   :  { %v987_v32 = vcombine.low %v979_v61, %v986_v1  ;;  %v1140_v4 = vsub.s32 %v1525_v26, %v2268_v58  ;;  %v1004_v9 = vcombine.low %v996_v53, %v1003_v11  ;;  %v1094_v55 = vsel %vm2297_vm12, %v1083_v17, %v1085_v40 }
  0xf7   :  { %v1095_v23 = vsel %vm2297_vm12, %v1081_v2, %v1083_v17  ;;  %v1141_v30 = vsub.s32 %v1528_v27, %v2268_v58  ;;  %vm1124_vm15 = vcmp.ne.s32.totalorder %v1836_v54, 0  ;;  %vm2406_vm0 = vcmp.lt.u32.totalorder %v1134_v45, 1024  ;;  %v1089_v45 = vpop.permute.xlu1 %1088 }
  0xf8   :  { %1008 = vst [vmem:[#allocation7 + $0x40] sm:$0xff] %v987_v32  ;;  %v1107_v21 = vsel %vm1102_vm13, %v1096_v39, %v1095_v23  ;;  %v1108_v25 = vsel %vm1102_vm13, %v1095_v23, %v1094_v55  ;;  %1009 = vst [vmem:[#allocation7 + $0x48] sm:$0xff] %v1004_v9  ;;  %vm2417_vm1 = vcmp.lt.u32.totalorder %v1135_v57, 1024  ;;  %vm2424_vm2 = vcmp.lt.u32.totalorder %v1136_v12, 1024  ;;  %v1087_v19 = vpop.permute.xlu0 %1086 }
  0xf9   :  { %v1118_v27 = vsel %vm1113_vm14, %v1105_v56, %v1107_v21  ;;  %v1119_v8 = vsel %vm1113_vm14, %v1106_v20, %v1108_v25  ;;  %vm2428_vm3 = vcmp.lt.u32.totalorder %v1137_v33, 1024  ;;  %vm2432_vm4 = vcmp.lt.u32.totalorder %v1138_v14, 1024 }
  0xfa   :  { %vm2436_vm5 = vcmp.lt.u32.totalorder %v1139_v37, 1024  ;;  %vm2440_vm6 = vcmp.lt.u32.totalorder %v1140_v4, 1024  ;;  %v1099_v58 = vsel %vm2297_vm12, %v1089_v45, %v1075_v10  ;;  %vm2446_vm7 = vcmp.lt.u32.totalorder %v1141_v30, 1024 }
  0xfb   :  { %v1092_v35 = vsel %vm2297_vm12, %v1087_v19, %v1089_v45  ;;  %v1093_v13 = vsel %vm2297_vm12, %v1085_v40, %v1087_v19  ;;  %v1104_v42 = vsel %vm1102_vm13, %v1099_v58, %v1098_v41 }
  0xfc   :  { %v1103_v47 = vsel %vm1102_vm13, %v1092_v35, %v1099_v58  ;;  %v1109_v50 = vsel %vm1102_vm13, %v1094_v55, %v1093_v13  ;;  %v1110_v10 = vsel %vm1102_vm13, %v1093_v13, %v1092_v35  ;;  %v1117_v0 = vsel %vm1113_vm14, %v1104_v42, %v1106_v20 }
  0xfd   :  { %v1114_v43 = vsel %vm1113_vm14, %v1109_v50, %v1103_v47  ;;  %v1115_v51 = vsel %vm1113_vm14, %v1110_v10, %v1104_v42  ;;  %v1116_v62 = vsel %vm1113_vm14, %v1103_v47, %v1105_v56  ;;  %v1120_v49 = vsel %vm1113_vm14, %v1107_v21, %v1109_v50 }
  0xfe   :  { %v1121_v44 = vsel %vm1113_vm14, %v1108_v25, %v1110_v10  ;;  %v1125_v34 = vsel %vm1124_vm15, %v1118_v27, %v1114_v43  ;;  %v1126_v15 = vsel %vm1124_vm15, %v1119_v8, %v1115_v51  ;;  %v1127_v59 = vsel %vm1124_vm15, %v1120_v49, %v1116_v62 }
  0xff   :  { %v1128_v5 = vsel %vm1124_vm15, %v1121_v44, %v1117_v0  ;;  %v1129_v63 = vsel %vm1124_vm15, %v1114_v43, %v1118_v27  ;;  %v1130_v36 = vsel %vm1124_vm15, %v1115_v51, %v1119_v8  ;;  %v1131_v46 = vsel %vm1124_vm15, %v1116_v62, %v1120_v49 }
 0x100   :  { %v1132_v29 = vsel %vm1124_vm15, %v1117_v0, %v1121_v44  ;;  %v1150_v52 = vsel %vm2406_vm0, %v1125_v34, 0.0  ;;  %v1151_v22 = vsel %vm2417_vm1, %v1126_v15, 0.0  ;;  %v1152_v48 = vsel %vm2424_vm2, %v1127_v59, 0.0 }
 0x101   :  { %v1153_v2 = vsel %vm2428_vm3, %v1128_v5, 0.0  ;;  %v1154_v28 = vsel %vm2432_vm4, %v1129_v63, 0.0  ;;  %v1155_v38 = vsel %vm2436_vm5, %v1130_v36, 0.0  ;;  %v1156_v54 = vsel %vm2440_vm6, %v1131_v46, 0.0 }
 0x102   :  { %v1157_v31 = vsel %vm2446_vm7, %v1132_v29, 0.0  ;;  %v1166_v39 = vcombine.low %v1150_v52, %v1151_v22  ;;  %v1167_v33 = vcombine.low %v1152_v48, %v1153_v2  ;;  %v1183_v61 = vcombine.low %v1154_v28, %v1155_v38 }
 0x103   :  { %v1184_v1 = vcombine.low %v1156_v54, %v1157_v31 }
 0x104   :  { %v1174_v41 = vrot.slane %v1166_v39, %v1359_v7  ;;  %v1181_v24 = vrot.slane %v1167_v33, %v1359_v7  ;;  %v1191_v53 = vrot.slane %v1183_v61, %v1359_v7 }
 0x105   :  { %v1198_v11 = vrot.slane %v1184_v1, %v1359_v7 }
 0x106   :  { %v1182_v56 = vcombine.low %v1174_v41, %v1181_v24 }
 0x107   :  { %v1199_v20 = vcombine.low %v1191_v53, %v1198_v11 }
 0x108   :  { %1203 = vst [vmem:[#allocation7 + $0x50] sm:$0xff] %v1182_v56 }
 0x109   :  { %1204 = vst [vmem:[#allocation7 + $0x58] sm:$0xff] %v1199_v20 }
 0x10a   :  { %1302 = shalt.err (!%p1299_p7)
}
 0x10b   :  { %1216 = dma.vmem_to_hbm [thread:$0]  %s1211_s24, 1536, %s2518_s2, [#allocation6], %s1319_s15, %s1319_s15, %s1320_s16  }
 0x10c   :  { %1315 = dma.done.wait [#allocation6], 1536  }
 0x10d   :  { %1316 = vsyncadd [#allocation6], 4294965760 }
 0x10e   :  { %1220 = vsyncpa [#allocation5], 1 }
 0x10f   :  { %1221 = vsyncpa [#allocation6], 1 }

</bundles_post_ra>
